<compile_context>
chip_gen: v7x
topology: tpu7x:2x2x1
jax: 0.10.0
libtpu: 0.0.40
codegen_flags: <defaults>
</compile_context>

<pallas_src>
import functools

import jax
import jax.numpy as jnp
from jax.experimental import pallas as pl
from jax.experimental.pallas import tpu as pltpu

INPUT_DIM = 784
OUTPUT_DIM = 10
TB_MAX = 4096  # batch-tile cap (rows); sized below so double-buffers fit v7x VMEM


def _round_up(x, m):
    return ((x + m - 1) // m) * m


def logreg_kernel(x_ref, wt_ref, b_ref, o_ref):
    # x_ref:  (TB, 784)  VMEM   (streamed per grid step; f32 or bf16)
    # wt_ref: (784, C)   VMEM   (resident: constant index_map)
    # b_ref:  (1, C)     VMEM   (resident, f32)
    # o_ref:  (TB, C)    VMEM   -> log_softmax(x @ Wt + b) along last axis (f32)
    logits = (
        jnp.dot(x_ref[...], wt_ref[...], preferred_element_type=jnp.float32)
        + b_ref[...].astype(jnp.float32)
    )  # (TB, C) f32

    # Numerically stable log-softmax over the class (last) axis; keep all math in f32
    # (v5e VPU/EUP have no bf16 path, and f32 is needed for accuracy anyway).
    m = jnp.max(logits, axis=-1, keepdims=True)
    shifted = logits - m
    lse = jnp.log(jnp.sum(jnp.exp(shifted), axis=-1, keepdims=True))
    o_ref[...] = shifted - lse


def _choose_batch_tile(B, tb_max):
    """Pick a batch tile so the grid has >= 2 tiles and an even tile count.

    >= 2 tiles  -> BlockSpec double-buffering actually overlaps DMA with compute.
    even count  -> dimension_semantics=("parallel",) load-balances v7x's 2 TensorCores
                   (no-op on v5e/v6e).  Tiles are multiples of 8 rows (sublane).
    """
    if B <= 16:
        return B  # too small to split into >= 8-row tiles; full-array block is legal
    n_tiles = max(2, pl.cdiv(B, tb_max))
    n_tiles += n_tiles % 2  # make even
    tb = _round_up(pl.cdiv(B, n_tiles), 8)
    return min(tb, tb_max)


@functools.partial(jax.jit, static_argnames=("tb_max", "input_dtype"))
def logistic_regression_forward(x, weight, bias, *, tb_max=TB_MAX,
                                input_dtype=jnp.bfloat16):
    """x: any shape reshapeable to (-1, 784); weight: (C, 784); bias: (C,)."""
    x2d = x.reshape(-1, INPUT_DIM).astype(input_dtype)
    B = x2d.shape[0]
    C = weight.shape[0]
    # Pre-transpose once (outside the kernel); trivial at (784, C).
    wt = jnp.asarray(weight, input_dtype).T              # (784, C)
    b2d = jnp.asarray(bias, jnp.float32).reshape(1, C)   # (1, C)

    tb = _choose_batch_tile(B, tb_max)
    grid = (pl.cdiv(B, tb),)

    itemsize = jnp.dtype(input_dtype).itemsize

    # VMEM budget from actual lane-padded, double-buffered tiles (+ Mosaic headroom).
    k_pad = _round_up(INPUT_DIM, 128)   # 896 lanes in VMEM for the 784 axis
    c_pad = _round_up(C, 128)           # C=10 pads to 128 lanes in VMEM
    vmem_bytes = int(
        2 * tb * k_pad * itemsize            # double-buffered x tiles
        + 2 * tb * c_pad * 4                 # double-buffered output tiles (f32)
        + 2 * (INPUT_DIM * c_pad * itemsize  # resident weight (conservatively x2)
               + 8 * c_pad * 4)              # bias
        + (8 << 20)                          # Mosaic internal scratch headroom
    )

    cost = pl.CostEstimate(
        flops=2 * B * INPUT_DIM * C,
        transcendentals=B * (C + 1),                      # exp per logit + log per row
        bytes_accessed=(B * INPUT_DIM * itemsize          # x stream (dominant)
                        + INPUT_DIM * C * itemsize        # weight (once)
                        + C * 4                           # bias
                        + B * C * 4),                     # output
    )

    out = pl.pallas_call(
        logreg_kernel,
        out_shape=jax.ShapeDtypeStruct((B, C), jnp.float32),
        grid=grid,
        in_specs=[
            pl.BlockSpec((tb, INPUT_DIM), lambda i: (i, 0)),   # x: streamed per tile
            pl.BlockSpec((INPUT_DIM, C), lambda i: (0, 0)),    # Wt: resident
            pl.BlockSpec((1, C), lambda i: (0, 0)),            # bias: resident
        ],
        out_specs=pl.BlockSpec((tb, C), lambda i: (i, 0)),
        compiler_params=pltpu.CompilerParams(
            dimension_semantics=("parallel",),   # shards batch tiles across TCs (v7x)
            vmem_limit_bytes=vmem_bytes,
            # Let XLA fuse the reshape/f32->bf16 cast of x into the kernel's DMA read
            # instead of materializing a bf16 copy of x in HBM first.
            allow_input_fusion=[True, False, False],
        ),
        cost_estimate=cost,
    )(x2d, wt, b2d)
    return out


if __name__ == "__main__":
    key = jax.random.PRNGKey(0)
    kx, kw, kb = jax.random.split(key, 3)

    # Deterministic PyTorch-Linear-style init: U(-1/sqrt(in), 1/sqrt(in))
    bound = 1.0 / (INPUT_DIM ** 0.5)
    weight = jax.random.uniform(kw, (OUTPUT_DIM, INPUT_DIM),
                                minval=-bound, maxval=bound, dtype=jnp.float32)
    bias = jax.random.uniform(kb, (OUTPUT_DIM,),
                              minval=-bound, maxval=bound, dtype=jnp.float32)

    # --- small batch, f32 x-stream (tight check vs plain XLA reference) ---
    B = 8
    x = jax.random.normal(kx, (B, 1, 28, 28), dtype=jnp.float32)
    out_f32 = jax.block_until_ready(
        logistic_regression_forward(x, weight, bias, input_dtype=jnp.float32))
    x2d = x.reshape(-1, INPUT_DIM)
    ref = jax.nn.log_softmax(x2d @ weight.T + bias, axis=-1)
    assert out_f32.shape == (B, OUTPUT_DIM)
    assert bool(jnp.allclose(out_f32, ref, atol=1e-5, rtol=1e-5))
    row_sums = jnp.sum(jnp.exp(out_f32), axis=-1)
    assert bool(jnp.all(jnp.abs(row_sums - 1.0) < 1e-4))

    # --- default bf16 x-stream path, 2-tile grid with a partial last tile ---
    B2 = 40
    x2 = jax.random.normal(kx, (B2, 1, 28, 28), dtype=jnp.float32)
    out_bf16 = jax.block_until_ready(logistic_regression_forward(x2, weight, bias))
    x2b = x2.reshape(-1, INPUT_DIM).astype(jnp.bfloat16).astype(jnp.float32)
    wb = weight.astype(jnp.bfloat16).astype(jnp.float32)
    ref2 = jax.nn.log_softmax(x2b @ wb.T + bias, axis=-1)
    assert out_bf16.shape == (B2, OUTPUT_DIM)
    assert bool(jnp.allclose(out_bf16, ref2, atol=5e-3, rtol=5e-3))
    row_sums2 = jnp.sum(jnp.exp(out_bf16), axis=-1)
    assert bool(jnp.all(jnp.abs(row_sums2 - 1.0) < 1e-3))

    # --- larger batch exercising an even multi-tile grid under a small tb_max cap ---
    B3 = 300
    x3 = jax.random.normal(kx, (B3, INPUT_DIM), dtype=jnp.float32)
    out3 = jax.block_until_ready(
        logistic_regression_forward(x3, weight, bias, tb_max=128))  # grid=(4,)
    x3b = x3.astype(jnp.bfloat16).astype(jnp.float32)
    ref3 = jax.nn.log_softmax(x3b @ wb.T + bias, axis=-1)
    assert out3.shape == (B3, OUTPUT_DIM)
    assert bool(jnp.allclose(out3, ref3, atol=5e-3, rtol=5e-3))

    print("KERNEL_OK")
</pallas_src>

<mosaic_0001>
module attributes {stable_mosaic.version = 11 : i64} {
  func.func @logreg_kernel(%arg0: i32, %arg1: memref<8x784xf32, #tpu.memory_space<vmem>>, %arg2: memref<784x10xf32, #tpu.memory_space<vmem>>, %arg3: memref<1x10xf32, #tpu.memory_space<vmem>>, %arg4: memref<8x10xf32, #tpu.memory_space<vmem>>) attributes {dimension_semantics = [#tpu.dimension_semantics<parallel>], iteration_bounds = array<i64: 1>, scalar_prefetch = 0 : i64, scratch_operands = 0 : i64, tpu.core_type = #tpu.core_type<tc>, window_params = [{transform_indices = @transform_0, window_bounds = array<i64: 8, 784>}, {pipeline_mode = #tpu.pipeline_mode<synchronous>, transform_indices = @transform_1, window_bounds = array<i64: 784, 10>}, {pipeline_mode = #tpu.pipeline_mode<synchronous>, transform_indices = @transform_2, window_bounds = array<i64: 1, 10>}, {transform_indices = @transform_3, window_bounds = array<i64: 8, 10>}]} {
    %c0 = arith.constant 0 : index
    %c0_0 = arith.constant 0 : index
    %0 = vector.load %arg1[%c0, %c0_0] : memref<8x784xf32, #tpu.memory_space<vmem>>, vector<8x784xf32>
    %c0_1 = arith.constant 0 : index
    %c0_2 = arith.constant 0 : index
    %1 = vector.load %arg2[%c0_1, %c0_2] : memref<784x10xf32, #tpu.memory_space<vmem>>, vector<784x10xf32>
    %cst = arith.constant dense<0.000000e+00> : vector<8x10xf32>
    %2 = tpu.matmul %0, %1, %cst {dimension_numbers = #tpu.dot_dimension_numbers<[1], [0], [0], [1], [0, 0, 1, 1], [], []>} : vector<8x784xf32>, vector<784x10xf32>, vector<8x10xf32> -> vector<8x10xf32>
    %c0_3 = arith.constant 0 : index
    %c0_4 = arith.constant 0 : index
    %3 = vector.load %arg3[%c0_3, %c0_4] : memref<1x10xf32, #tpu.memory_space<vmem>>, vector<1x10xf32>
    %4 = vector.broadcast %3 : vector<1x10xf32> to vector<8x10xf32>
    %5 = arith.addf %2, %4 : vector<8x10xf32>
    %cst_5 = arith.constant dense<0xFF800000> : vector<8xf32>
    %6 = vector.multi_reduction <maximumf>, %5, %cst_5 [1] : vector<8x10xf32> to vector<8xf32>
    %7 = vector.shape_cast %6 : vector<8xf32> to vector<8x1xf32>
    %8 = vector.broadcast %7 : vector<8x1xf32> to vector<8x10xf32>
    %9 = arith.subf %5, %8 : vector<8x10xf32>
    %10 = math.exp %9 : vector<8x10xf32>
    %cst_6 = arith.constant dense<0.000000e+00> : vector<8xf32>
    %11 = vector.multi_reduction <add>, %10, %cst_6 [1] : vector<8x10xf32> to vector<8xf32>
    %12 = vector.shape_cast %11 : vector<8xf32> to vector<8x1xf32>
    %13 = math.log %12 : vector<8x1xf32>
    %14 = vector.broadcast %13 : vector<8x1xf32> to vector<8x10xf32>
    %15 = arith.subf %9, %14 : vector<8x10xf32>
    %c0_7 = arith.constant 0 : index
    %c0_8 = arith.constant 0 : index
    %16 = vector.load %arg4[%c0_7, %c0_8] : memref<8x10xf32, #tpu.memory_space<vmem>>, vector<8x10xf32>
    tpu.vector_store %arg4[%c0_7, %c0_8], %15 {strides = array<i32>} : memref<8x10xf32, #tpu.memory_space<vmem>>, vector<8x10xf32>,
    return
  }
  func.func @transform_0(%arg0: i32) -> (i32, i32) {
    %c0_i32 = arith.constant 0 : i32
    %c0_i32_0 = arith.constant 0 : i32
    return %arg0, %c0_i32 : i32, i32
  }
  func.func @transform_1(%arg0: i32) -> (i32, i32) {
    %c0_i32 = arith.constant 0 : i32
    %c0_i32_0 = arith.constant 0 : i32
    %c0_i32_1 = arith.constant 0 : i32
    return %c0_i32, %c0_i32_0 : i32, i32
  }
  func.func @transform_2(%arg0: i32) -> (i32, i32) {
    %c0_i32 = arith.constant 0 : i32
    %c0_i32_0 = arith.constant 0 : i32
    %c0_i32_1 = arith.constant 0 : i32
    return %c0_i32, %c0_i32_0 : i32, i32
  }
  func.func @transform_3(%arg0: i32) -> (i32, i32) {
    %c0_i32 = arith.constant 0 : i32
    %c0_i32_0 = arith.constant 0 : i32
    return %arg0, %c0_i32 : i32, i32
  }
}

</mosaic_0001>

<bundles_post_ra>
// kernel: logistic_regression_forward.1
= control target key start
LH: loop header
LB: loop body
LE: loop exit
PB: predicated region body
PF: predicated region fallthrough
CT: control target
= control target key end

     0   :  { %s1044_s0 = inlined_call_operand.vmem [shape: f32[8,784], index: 0, kind: input, shape index: {}]   ;;  %s1045_s1 = inlined_call_operand.vmem [shape: f32[784,10], index: 1, kind: input, shape index: {}]   ;;  %s1046_s2 = inlined_call_operand.vmem [shape: f32[1,10], index: 2, kind: input, shape index: {}]   ;;  %s1047_s3 = inlined_call_operand.hbm [shape: f32[8,10], index: 3, kind: output, shape index: {}]  }
   0x1   :  { %v38_v0 = vld [vmem:[%s1045_s1 + $0x80] sm:$0xff]  ;;  %v39_v1 = vld [vmem:[%s1045_s1 + $0x88] sm:$0xff]  ;;  %v40_v11 = vld [vmem:[%s1045_s1 + $0x90] sm:$0xff] }
   0x2   :  { %v22_v2 = vld [vmem:[%s1045_s1] sm:$0xff]  ;;  %v556_v3 = vpack.c.bf16 %v39_v1, %v38_v0  ;;  %v23_v4 = vld [vmem:[%s1045_s1 + $0x8] sm:$0xff]  ;;  %v41_v13 = vld [vmem:[%s1045_s1 + $0x98] sm:$0xff] }
   0x3   :  { %v70_v5 = vld [vmem:[%s1045_s1 + $0x180] sm:$0xff]  ;;  %v71_v6 = vld [vmem:[%s1045_s1 + $0x188] sm:$0xff]  ;;  %v558_v7 = vpack.c.bf16 %v23_v4, %v22_v2  ;;  %v24_v14 = vld [vmem:[%s1045_s1 + $0x10] sm:$0xff]  ;;  %v560_v16 = vpack.c.bf16 %v41_v13, %v40_v11 }
   0x4   :  { %v588_v8 = vpack.c.bf16 %v71_v6, %v70_v5  ;;  %v54_v9 = vld [vmem:[%s1045_s1 + $0x100] sm:$0xff]  ;;  %v55_v10 = vld [vmem:[%s1045_s1 + $0x108] sm:$0xff]  ;;  %557 = vmatprep.subr.bf16.mxu0 %v556_v3  ;;  %v25_v15 = vld [vmem:[%s1045_s1 + $0x18] sm:$0xff] }
   0x5   :  { %v590_v12 = vpack.c.bf16 %v55_v10, %v54_v9  ;;  %559 = vmatpush3.bf16.msra.mxu0 %v558_v7  ;;  %v562_v17 = vpack.c.bf16 %v25_v15, %v24_v14  ;;  %v72_v18 = vld [vmem:[%s1045_s1 + $0x190] sm:$0xff]  ;;  %v73_v19 = vld [vmem:[%s1045_s1 + $0x198] sm:$0xff]  ;;  %v42_v23 = vld [vmem:[%s1045_s1 + $0xa0] sm:$0xff] }
   0x6   :  { %589 = vmatprep.subr.bf16.mxu1 %v588_v8  ;;  %v56_v20 = vld [vmem:[%s1045_s1 + $0x110] sm:$0xff]  ;;  %v592_v21 = vpack.c.bf16 %v73_v19, %v72_v18  ;;  %v57_v22 = vld [vmem:[%s1045_s1 + $0x118] sm:$0xff]  ;;  %v43_v24 = vld [vmem:[%s1045_s1 + $0xa8] sm:$0xff]  ;;  %561 = vmatprep.subr.bf16.mxu0 %v560_v16 }
   0x7   :  { %591 = vmatpush3.bf16.msra.mxu1 %v590_v12  ;;  %v594_v25 = vpack.c.bf16 %v57_v22, %v56_v20  ;;  %v564_v26 = vpack.c.bf16 %v43_v24, %v42_v23  ;;  %v26_v27 = vld [vmem:[%s1045_s1 + $0x20] sm:$0xff]  ;;  %v27_v28 = vld [vmem:[%s1045_s1 + $0x28] sm:$0xff]  ;;  %v44_v35 = vld [vmem:[%s1045_s1 + $0xb0] sm:$0xff] }
   0x8   :  { %v74_v29 = vld [vmem:[%s1045_s1 + $0x1a0] sm:$0xff]  ;;  %593 = vmatprep.subr.bf16.mxu1 %v592_v21  ;;  %v75_v30 = vld [vmem:[%s1045_s1 + $0x1a8] sm:$0xff]  ;;  %v566_v33 = vpack.c.bf16 %v27_v28, %v26_v27  ;;  %v45_v36 = vld [vmem:[%s1045_s1 + $0xb8] sm:$0xff] }
   0x9   :  { %v58_v31 = vld [vmem:[%s1045_s1 + $0x120] sm:$0xff]  ;;  %v59_v32 = vld [vmem:[%s1045_s1 + $0x128] sm:$0xff]  ;;  %563 = vmatpush3.bf16.msra.mxu0 %v562_v17  ;;  %v596_v34 = vpack.c.bf16 %v75_v30, %v74_v29  ;;  %v28_v37 = vld [vmem:[%s1045_s1 + $0x30] sm:$0xff]  ;;  %v568_v39 = vpack.c.bf16 %v45_v36, %v44_v35 }
   0xa   :  { %565 = vmatprep.subr.bf16.mxu0 %v564_v26  ;;  %v598_v38 = vpack.c.bf16 %v59_v32, %v58_v31  ;;  %v29_v40 = vld [vmem:[%s1045_s1 + $0x38] sm:$0xff]  ;;  %v76_v41 = vld [vmem:[%s1045_s1 + $0x1b0] sm:$0xff]  ;;  %v46_v46 = vld [vmem:[%s1045_s1 + $0xc0] sm:$0xff] }
   0xb   :  { %595 = vmatpush3.bf16.msra.mxu1 %v594_v25  ;;  %v77_v42 = vld [vmem:[%s1045_s1 + $0x1b8] sm:$0xff]  ;;  %v60_v44 = vld [vmem:[%s1045_s1 + $0x130] sm:$0xff]  ;;  %v47_v47 = vld [vmem:[%s1045_s1 + $0xc8] sm:$0xff]  ;;  %v570_v48 = vpack.c.bf16 %v29_v40, %v28_v37 }
   0xc   :  { %597 = vmatprep.subr.bf16.mxu1 %v596_v34  ;;  %v600_v43 = vpack.c.bf16 %v77_v42, %v76_v41  ;;  %v61_v45 = vld [vmem:[%s1045_s1 + $0x138] sm:$0xff]  ;;  %v78_v49 = vld [vmem:[%s1045_s1 + $0x1c0] sm:$0xff]  ;;  %v79_v50 = vld [vmem:[%s1045_s1 + $0x1c8] sm:$0xff]  ;;  %v572_v52 = vpack.c.bf16 %v47_v47, %v46_v46 }
   0xd   :  { %567 = vmatpush3.bf16.msra.mxu0 %v566_v33  ;;  %v602_v51 = vpack.c.bf16 %v61_v45, %v60_v44  ;;  %v30_v53 = vld [vmem:[%s1045_s1 + $0x40] sm:$0xff]  ;;  %v31_v54 = vld [vmem:[%s1045_s1 + $0x48] sm:$0xff]  ;;  %v604_v56 = vpack.c.bf16 %v79_v50, %v78_v49  ;;  %v48_v58 = vld [vmem:[%s1045_s1 + $0xd0] sm:$0xff]  ;;  %v687_v50 = vmov 0.0|0.0  }
   0xe   :  { %569 = vmatprep.subr.bf16.mxu0 %v568_v39  ;;  %v62_v55 = vld [vmem:[%s1045_s1 + $0x140] sm:$0xff]  ;;  %v63_v57 = vld [vmem:[%s1045_s1 + $0x148] sm:$0xff]  ;;  %v49_v59 = vld [vmem:[%s1045_s1 + $0xd8] sm:$0xff]  ;;  %v574_v62 = vpack.c.bf16 %v31_v54, %v30_v53 }
   0xf   :  { %599 = vmatpush3.bf16.msra.mxu1 %v598_v38  ;;  %v80_v60 = vld [vmem:[%s1045_s1 + $0x1d0] sm:$0xff]  ;;  %v81_v61 = vld [vmem:[%s1045_s1 + $0x1d8] sm:$0xff]  ;;  %v606_v63 = vpack.c.bf16 %v63_v57, %v62_v55  ;;  %v576_v0 = vpack.c.bf16 %v49_v59, %v48_v58  ;;  %v50_v6 = vld [vmem:[%s1045_s1 + $0xe0] sm:$0xff] }
  0x10   :  { %601 = vmatprep.subr.bf16.mxu1 %v600_v43  ;;  %v32_v1 = vld [vmem:[%s1045_s1 + $0x50] sm:$0xff]  ;;  %v33_v2 = vld [vmem:[%s1045_s1 + $0x58] sm:$0xff]  ;;  %v608_v4 = vpack.c.bf16 %v81_v61, %v80_v60  ;;  %v51_v7 = vld [vmem:[%s1045_s1 + $0xe8] sm:$0xff] }
  0x11   :  { %571 = vmatpush3.bf16.msra.mxu0 %v570_v48  ;;  %v64_v3 = vld [vmem:[%s1045_s1 + $0x150] sm:$0xff]  ;;  %v65_v5 = vld [vmem:[%s1045_s1 + $0x158] sm:$0xff]  ;;  %v82_v8 = vld [vmem:[%s1045_s1 + $0x1e0] sm:$0xff]  ;;  %v578_v10 = vpack.c.bf16 %v33_v2, %v32_v1  ;;  %v580_v14 = vpack.c.bf16 %v51_v7, %v50_v6 }
  0x12   :  { %573 = vmatprep.subr.bf16.mxu0 %v572_v52  ;;  %v83_v9 = vld [vmem:[%s1045_s1 + $0x1e8] sm:$0xff]  ;;  %v34_v11 = vld [vmem:[%s1045_s1 + $0x60] sm:$0xff]  ;;  %v610_v13 = vpack.c.bf16 %v65_v5, %v64_v3  ;;  %v52_v19 = vld [vmem:[%s1045_s1 + $0xf0] sm:$0xff] }
  0x13   :  { %603 = vmatpush3.bf16.msra.mxu1 %v602_v51  ;;  %v16_v12 = vld [vmem:[%s1044_s0 + $0x8] sm:$0xff]  ;;  %v66_v16 = vld [vmem:[%s1045_s1 + $0x160] sm:$0xff]  ;;  %v612_v18 = vpack.c.bf16 %v83_v9, %v82_v8  ;;  %v53_v20 = vld [vmem:[%s1045_s1 + $0xf8] sm:$0xff] }
  0x14   :  { %605 = vmatprep.subr.bf16.mxu1 %v604_v56  ;;  %v35_v15 = vld [vmem:[%s1045_s1 + $0x68] sm:$0xff]  ;;  %195 = vmatprep.mubr.f32.mxu0 %v16_v12  ;;  %v18_v21 = vld [vmem:[%s1044_s0 + $0x18] sm:$0xff]  ;;  %v84_v22 = vld [vmem:[%s1045_s1 + $0x1f0] sm:$0xff]  ;;  %v584_v26 = vpack.c.bf16 %v53_v20, %v52_v19 }
  0x15   :  { %575 = vmatpush3.bf16.msra.mxu0 %v574_v62  ;;  %v67_v17 = vld [vmem:[%s1045_s1 + $0x168] sm:$0xff]  ;;  %v85_v23 = vld [vmem:[%s1045_s1 + $0x1f8] sm:$0xff]  ;;  %265 = vmatprep.mubr.f32.mxu1 %v18_v21  ;;  %v582_v24 = vpack.c.bf16 %v35_v15, %v34_v11  ;;  %v36_v27 = vld [vmem:[%s1045_s1 + $0x70] sm:$0xff] }
  0x16   :  { %577 = vmatprep.subr.bf16.mxu0 %v576_v0  ;;  %v614_v25 = vpack.c.bf16 %v67_v17, %v66_v16  ;;  %v37_v28 = vld [vmem:[%s1045_s1 + $0x78] sm:$0xff]  ;;  %v68_v29 = vld [vmem:[%s1045_s1 + $0x170] sm:$0xff]  ;;  %v616_v30 = vpack.c.bf16 %v85_v23, %v84_v22  ;;  %v102_v32 = vld [vmem:[%s1045_s1 + $0x280] sm:$0xff] }
  0x17   :  { %607 = vmatpush3.bf16.msra.mxu1 %v606_v63  ;;  %v69_v31 = vld [vmem:[%s1045_s1 + $0x178] sm:$0xff]  ;;  %v103_v33 = vld [vmem:[%s1045_s1 + $0x288] sm:$0xff]  ;;  %v586_v34 = vpack.c.bf16 %v37_v28, %v36_v27  ;;  %v86_v37 = vld [vmem:[%s1045_s1 + $0x200] sm:$0xff] }
  0x18   :  { %609 = vmatprep.subr.bf16.mxu1 %v608_v4  ;;  %v618_v35 = vpack.c.bf16 %v69_v31, %v68_v29  ;;  %v620_v36 = vpack.c.bf16 %v103_v33, %v102_v32  ;;  %v87_v38 = vld [vmem:[%s1045_s1 + $0x208] sm:$0xff]  ;;  %v104_v39 = vld [vmem:[%s1045_s1 + $0x290] sm:$0xff]  ;;  %v105_v40 = vld [vmem:[%s1045_s1 + $0x298] sm:$0xff] }
  0x19   :  { %579 = vmatpush3.bf16.msra.mxu0 %v578_v10  ;;  %v15_v41 = vld [vmem:[%s1044_s0] sm:$0xff]  ;;  %v622_v42 = vpack.c.bf16 %v87_v38, %v86_v37  ;;  %v17_v43 = vld [vmem:[%s1044_s0 + $0x10] sm:$0xff]  ;;  %v624_v45 = vpack.c.bf16 %v105_v40, %v104_v39  ;;  %v89_v46 = vld [vmem:[%s1045_s1 + $0x218] sm:$0xff] }
  0x1a   :  { %581 = vmatprep.subr.bf16.mxu0 %v580_v14  ;;  %v88_v44 = vld [vmem:[%s1045_s1 + $0x210] sm:$0xff]  ;;  %v106_v47 = vld [vmem:[%s1045_s1 + $0x2a0] sm:$0xff]  ;;  %v107_v48 = vld [vmem:[%s1045_s1 + $0x2a8] sm:$0xff] }
  0x1b   :  { %611 = vmatpush3.bf16.msra.mxu1 %v610_v13  ;;  %v20_v49 = vld [vmem:[%s1044_s0 + $0x28] sm:$0xff]  ;;  %v118_v51 = vld [vmem:[%s1045_s1 + $0x300] sm:$0xff] }
  0x1c   :  { %613 = vmatprep.subr.bf16.mxu1 %v612_v18  ;;  %v119_v52 = vld [vmem:[%s1045_s1 + $0x308] sm:$0xff] }
  0x1d   :  { %583 = vmatpush3.bf16.msra.mxu0 %v582_v24  ;;  %v653_v53 = vpack.c.bf16 %v119_v52, %v118_v51 }
  0x1e   :  { %585 = vmatprep.subr.bf16.mxu0 %v584_v26 }
  0x1f   :  { %615 = vmatpush3.bf16.msra.mxu1 %v614_v25 }
  0x20   :  { %617 = vmatprep.subr.bf16.mxu1 %v616_v30 }
  0x21   :  { %587 = vmatpush3.bf16.msra.mxu0 %v586_v34 }
  0x22   :  { %621 = vmatprep.subr.bf16.mxu0 %v620_v36 }
  0x23   :  { %619 = vmatpush3.bf16.msra.mxu1 %v618_v35 }
  0x24   :  { %652 = vmatprep.subr.bf16.mxu1 %v687_v50  ;;  %196 = vmatmul.mubr.f32.vlgmr.msra.gmra.mrb[0].mxu0 %v15_v41 }
  0x25   :  { %8 = vsyncpa [#allocation3], 0  ;;  %623 = vmatpush3.bf16.msra.mxu0 %v622_v42  ;;  %v626_v54 = vpack.c.bf16 %v89_v46, %v88_v44  ;;  %v628_v55 = vpack.c.bf16 %v107_v48, %v106_v47  ;;  %v90_v56 = vld [vmem:[%s1045_s1 + $0x220] sm:$0xff]  ;;  %v91_v57 = vld [vmem:[%s1045_s1 + $0x228] sm:$0xff]  ;;  %335 = vmatprep.mubr.f32.mxu0 %v20_v49  ;;  %vm688_vm0 = vmmov 0   ;;  %v689_v60 = vmov 0.0  }
  0x26   :  { %266 = vmatmul.mubr.f32.vlgmr.msra.gmra.mrb[0].mxu1 %v17_v43  ;;  %625 = vmatprep.subr.bf16.mxu0 %v624_v45  ;;  %v108_v58 = vld [vmem:[%s1045_s1 + $0x2b0] sm:$0xff]  ;;  %v109_v59 = vld [vmem:[%s1045_s1 + $0x2b8] sm:$0xff]  ;;  %vm127_vm1 = vcmask 130048   ;;  %v630_v62 = vpack.c.bf16 %v91_v57, %v90_v56  ;;  %v110_v2 = vld [vmem:[%s1045_s1 + $0x2c0] sm:$0xff]  ;;  %vm411_vm2 = vcmask 80896  }
  0x27   :  { %654 = vmatpush3.bf16.msra.mxu1 %v653_v53  ;;  %553 = vmatprep.mubr.msk.f32.mxu1 %vm688_vm0, %v689_v60  ;;  %v21_v61 = vld [vmem:[%s1044_s0 + $0x30] sm:$0xff]  ;;  %v632_v63 = vpack.c.bf16 %v109_v59, %v108_v58  ;;  %v93_v1 = vld [vmem:[%s1045_s1 + $0x238] sm:$0xff]  ;;  %v111_v3 = vld [vmem:[%s1045_s1 + $0x2c8] sm:$0xff] }
  0x28   :  { %v92_v0 = vld [vmem:[%s1045_s1 + $0x230] sm:$0xff]  ;;  %v636_v5 = vpack.c.bf16 %v111_v3, %v110_v2  ;;  %v94_v6 = vld [vmem:[%s1045_s1 + $0x240] sm:$0xff]  ;;  %v95_v7 = vld [vmem:[%s1045_s1 + $0x248] sm:$0xff] }
  0x29   :  { %627 = vmatpush3.bf16.msra.mxu0 %v626_v54  ;;  %v634_v4 = vpack.c.bf16 %v93_v1, %v92_v0  ;;  %v112_v8 = vld [vmem:[%s1045_s1 + $0x2d0] sm:$0xff]  ;;  %v113_v9 = vld [vmem:[%s1045_s1 + $0x2d8] sm:$0xff]  ;;  %v638_v10 = vpack.c.bf16 %v95_v7, %v94_v6  ;;  %v114_v14 = vld [vmem:[%s1045_s1 + $0x2e0] sm:$0xff] }
  0x2a   :  { %629 = vmatprep.subr.bf16.mxu0 %v628_v55  ;;  %554 = vmatmul.mubr.msk.f32.vlgmr.msra.gmra.mrb[2].mxu1 %vm127_vm1, %v21_v61  ;;  %v640_v11 = vpack.c.bf16 %v113_v9, %v112_v8  ;;  %v96_v12 = vld [vmem:[%s1045_s1 + $0x250] sm:$0xff]  ;;  %v97_v13 = vld [vmem:[%s1045_s1 + $0x258] sm:$0xff]  ;;  %v115_v15 = vld [vmem:[%s1045_s1 + $0x2e8] sm:$0xff] }
  0x2b   :  { %v642_v16 = vpack.c.bf16 %v97_v13, %v96_v12  ;;  %v644_v17 = vpack.c.bf16 %v115_v15, %v114_v14  ;;  %v98_v18 = vld [vmem:[%s1045_s1 + $0x260] sm:$0xff]  ;;  %v99_v19 = vld [vmem:[%s1045_s1 + $0x268] sm:$0xff]  ;;  %v116_v20 = vld [vmem:[%s1045_s1 + $0x2f0] sm:$0xff] }
  0x2c   :  { %v117_v21 = vld [vmem:[%s1045_s1 + $0x2f8] sm:$0xff]  ;;  %v646_v22 = vpack.c.bf16 %v99_v19, %v98_v18  ;;  %v100_v24 = vld [vmem:[%s1045_s1 + $0x270] sm:$0xff]  ;;  %v19_v27 = vld [vmem:[%s1044_s0 + $0x20] sm:$0xff]  ;;  %s690_s0 = smov [#allocation2]  }
  0x2d   :  { %631 = vmatpush3.bf16.msra.mxu0 %v630_v62  ;;  %v648_v23 = vpack.c.bf16 %v117_v21, %v116_v20  ;;  %v101_v25 = vld [vmem:[%s1045_s1 + $0x278] sm:$0xff]  ;;  %v439_v29 = vld [vmem:[%s1046_s2] ss:$0 sm:$0xff]  ;;  %s431_s1 = sshll.u32 %s690_s0, 4  ;;  %s432_s1 = int_to_ptr.vmem [resolvable:$true] %s431_s1 }
  0x2e   :  { %633 = vmatprep.subr.bf16.mxu0 %v632_v63  ;;  %v650_v26 = vpack.c.bf16 %v101_v25, %v100_v24  ;;  %s663_s2 = scalar_lea.vmem %s432_s1, 128  ;;  %p668_p1 = scmp.lt.s32.totalorder %s432_s1, %s432_s1 }
  0x2f   :  { %p664_p0 = scmp.ne.s32.totalorder %s432_s1, %s663_s2  ;;  %p669_p2 = scmp.lt.s32.totalorder %s663_s2, %s663_s2 }
  0x31   :  { %635 = vmatpush3.bf16.msra.mxu0 %v634_v4  ;;  %p670_p3 = por %p669_p2, %p668_p1 }
  0x32   :  { %637 = vmatprep.subr.bf16.mxu0 %v636_v5 }
  0x33   :  { %p671_p4 = pnand %p670_p3, %p664_p0 }
  0x35   :  { %639 = vmatpush3.bf16.msra.mxu0 %v638_v10 }
  0x36   :  { %641 = vmatprep.subr.bf16.mxu0 %v640_v11 }
  0x39   :  { %643 = vmatpush3.bf16.msra.mxu0 %v642_v16 }
  0x3a   :  { %645 = vmatprep.subr.bf16.mxu0 %v644_v17 }
  0x3d   :  { %647 = vmatpush3.bf16.msra.mxu0 %v646_v22 }
  0x3e   :  { %649 = vmatprep.subr.bf16.mxu0 %v648_v23 }
  0x41   :  { %651 = vmatpush3.bf16.msra.mxu0 %v650_v26 }
  0x44   :  { %336 = vmatmul.mubr.f32.vlgmr.msra.gmra.mrb[2].mxu0 %v19_v27 }
  0xf7   :  { %v473_v28 = vpop.f32.mrb[0].mxu0 }
  0xf8   :  { %v474_v30 = vpop.f32.mrb[1].mxu0 }
  0xf9   :  { %v508_v31 = vpop.f32.mrb[0].mxu1  ;;  %v475_v32 = vadd.f32 %v474_v30, %v473_v28 }
  0xfa   :  { %v509_v33 = vpop.f32.mrb[1].mxu1 }
  0xfb   :  { %v510_v34 = vadd.f32 %v509_v33, %v508_v31  ;;  %v198_v35 = vadd.f32 %v475_v32, %v439_v29 }
  0xfd   :  { %v268_v36 = vadd.f32 %v510_v34, %v198_v35  ;;  %v407_v37 = vpop.f32.mrb[2].mxu1 }
  0xfe   :  { %v555_v38 = vpop.f32.mrb[3].mxu1 }
 0x117   :  { %v543_v39 = vpop.f32.mrb[2].mxu0 }
 0x118   :  { %v544_v40 = vpop.f32.mrb[3].mxu0 }
 0x119   :  { %v545_v41 = vadd.f32 %v544_v40, %v543_v39 }
 0x11b   :  { %v338_v42 = vadd.f32 %v545_v41, %v268_v36 }
 0x11d   :  { %v408_v43 = vadd.f32 %v407_v37, %v338_v42 }
 0x11f   :  { %v412_v44 = vsel %vm411_vm2, %v408_v43, -inf }
 0x120   :  { %413 = vmax.xlane.f32.xlu0 %v412_v44 }
 0x1ad   :  { %v414_v45 = vpop.xlane.xlu0 %413 }
 0x1ae   :  { %v415_v46 = vsub.f32 %v408_v43, %v414_v45 }
 0x1b0   :  { %v416_v47 = vmul.f32 1.442695, %v415_v46 }
 0x1b2   :  { %659 = vpow2.f32 %v416_v47 }
 0x1bc   :  { %v660_v48 = vpop.eup %659 }
 0x1bd   :  { %v418_v49 = vsel %vm411_vm2, %v660_v48, 0.0 }
 0x1be   :  { %419 = vadd.xlane.f32.xlu0 %v418_v49 }
 0x24b   :  { %v420_v50 = vpop.xlane.xlu0 %419 }
 0x24c   :  { %661 = vlog2.f32 %v420_v50 }
 0x256   :  { %v662_v51 = vpop.eup %661 }
 0x257   :  { %v422_v52 = vmul.f32 0.6931472, %v662_v51 }
 0x259   :  { %v423_v53 = vsub.f32 %v415_v46, %v422_v52 }
 0x25b   :  { %424 = vst.msk [vmem:[#allocation2] sm:$0xff] %vm411_vm2, %v423_v53 }
 0x25c   :  { %674 = shalt.err (!%p671_p4)
}
 0x25d   :  { %s675_s10 = scalar_lea.hbm %s1047_s3, 128 }
 0x25e   :  { %p676_p5 = scmp.ne.s32.totalorder %s1047_s3, %s675_s10  ;;  %p679_p6 = scmp.lt.u32.totalorder %s675_s10, %s1047_s3 }
 0x260   :  { %p681_p7 = pnand %p679_p6, %p676_p5 }
 0x262   :  { %684 = shalt.err (!%p681_p7)
}
 0x263   :  { %434 = dma.vmem_to_hbm [thread:$0]  %s432_s1, 128, %s1047_s3, [#allocation3]  }
 0x264   :  { %685 = dma.done.wait [#allocation3], 128  }
 0x265   :  { %686 = vsyncadd [#allocation3], 4294967168 }
 0x266   :  { %438 = vsyncpa [#allocation3], 1 }

</bundles_post_ra>
